<compile_context>
chip_gen: v7x
topology: tpu7x:2x2x1
jax: 0.10.0
libtpu: 0.0.40
codegen_flags: <defaults>
</compile_context>

<pallas_src>
import functools

import jax
import jax.numpy as jnp
from jax.experimental import pallas as pl
from jax.experimental.pallas import tpu as pltpu


# ------------------------------------------------------------------------------------
# Kernel 1: synthetic encoder projection + masked mean pooling (tiled over sentences)
# ------------------------------------------------------------------------------------
def encode_pool_kernel(emb_ref, pw_ref, w_ref, b_ref, pooled_ref):
    """
    emb_ref   : (tb, S, Hin)  bf16   chunk of stacked [src; tgt] token embeddings
    pw_ref    : (tb, S)       f32    per-token pooling weights (mask / len), zeros padded
    w_ref     : (Hin, H)      bf16   synthetic encoder projection weight
    b_ref     : (1, H)        f32    synthetic encoder projection bias
    pooled_ref: (tb, H)       f32    masked-mean pooled sentence embeddings (unnormalized)
    """
    tb, S, Hin = emb_ref.shape
    H = w_ref.shape[1]

    # --- synthetic encoder: one (tb*S, Hin) x (Hin, H) bf16 MXU matmul + tanh ---------
    # TODO(synk): real module uses BertModel.from_pretrained; replaced here by a
    # deterministic single-layer tanh projection encoder (no checkpoint available).
    # NOTE: tanh occupies the single EUP slot; it is free filler only once Hin is
    # BERT-like (>= a few hundred). At tiny Hin the EUP is the binding unit.
    emb = emb_ref[...].reshape(tb * S, Hin)                      # layout-free (S % 8 == 0)
    h = jnp.tanh(
        jnp.dot(emb, w_ref[...], preferred_element_type=jnp.float32) + b_ref[...]
    )                                                            # (tb*S, H) f32

    # --- masked mean pooling ('mean' pooler): VPU multiply + reduce over S ------------
    h3 = h.reshape(tb, S, H)
    pw = pw_ref[...][:, :, None]                                 # (tb, S, 1)
    pooled_ref[...] = jnp.sum(h3 * pw, axis=1)                   # (tb, H)


# ------------------------------------------------------------------------------------
# Kernel 2: L2 normalize + one Gram matrix + packed similarity writeback (tiny)
# ------------------------------------------------------------------------------------
def sim_pack_kernel(pooled_ref, lmask_ref, out_ref, *, inv_temp, sl_s, sl_t, batch):
    """
    pooled_ref: (2B, H)  f32  stacked pooled [src; tgt] embeddings
    lmask_ref : (B, B)   f32  logit mask ((src_ids equal) - eye)
    out_ref   : (B, 4B)  f32  packed [predict_logits | soft_label | ss_masked | tt_masked]
    """
    B = batch
    pooled = pooled_ref[...]

    # L2 normalize (sim_type == 'cos'): x * rsqrt(max(sumsq, 1e-24)) == x / max(||x||,1e-12)
    sumsq = jnp.sum(pooled * pooled, axis=-1, keepdims=True)
    pooled = pooled * jax.lax.rsqrt(jnp.maximum(sumsq, 1e-24))

    # one Gram matrix over stacked [src; tgt]; contraction on last dims -> no transposes
    gram = jax.lax.dot_general(pooled, pooled,
                               (((1,), (1,)), ((), ())),
                               preferred_element_type=jnp.float32)      # (2B, 2B)
    st = gram[:B, B:]          # src @ tgt.T
    ss = gram[:B, :B]          # src @ src.T
    tt = gram[B:, B:]          # tgt @ tgt.T

    penalty = lmask_ref[...] * 1e8

    # single packed writeback (one contiguous store instead of four lane-sparse ones)
    out_ref[...] = jnp.concatenate(
        [st * inv_temp - penalty,          # predict_logits (scaled then masked)
         sl_s * ss + sl_t * tt,            # soft_label (unmasked)
         ss - penalty,                     # masked src-src (hn branch)
         tt - penalty],                    # masked tgt-tgt (hn branch)
        axis=-1)


def rankrace_similarities(emb_stacked, pool_w, w, b, logit_mask,
                          temperature, sl_s, sl_t, *, tb=None):
    TB, S, Hin = emb_stacked.shape
    B = TB // 2
    H = w.shape[1]
    if tb is None:
        tb = min(TB, 8)                    # sentence-chunk tile (multiple of 8)
    assert TB % tb == 0

    # ---- stage 1: encode + pool, pipelined & parallel over sentence chunks ----------
    cost1 = pl.CostEstimate(
        flops=2 * TB * S * Hin * H + 2 * TB * S * H,
        transcendentals=TB * S * H,
        bytes_accessed=(TB * S * Hin * 2 + Hin * H * 2 + H * 4
                        + TB * S * 4 + TB * H * 4),
    )
    pooled = pl.pallas_call(
        encode_pool_kernel,
        out_shape=jax.ShapeDtypeStruct((TB, H), jnp.float32),
        grid=(TB // tb,),
        in_specs=[
            pl.BlockSpec((tb, S, Hin), lambda i: (i, 0, 0)),
            pl.BlockSpec((tb, S), lambda i: (i, 0)),
            pl.BlockSpec((Hin, H), lambda i: (0, 0)),
            pl.BlockSpec((1, H), lambda i: (0, 0)),
        ],
        out_specs=pl.BlockSpec((tb, H), lambda i: (i, 0)),
        compiler_params=pltpu.CompilerParams(
            dimension_semantics=("parallel",),
            vmem_limit_bytes=48 * 1024 * 1024),
        cost_estimate=cost1,
    )(emb_stacked, pool_w, w, b)

    # ---- stage 2: normalize + Gram + packed similarities (tiny, single block) --------
    kern2 = functools.partial(
        sim_pack_kernel, inv_temp=1.0 / temperature, sl_s=sl_s, sl_t=sl_t, batch=B)
    packed = pl.pallas_call(
        kern2,
        out_shape=jax.ShapeDtypeStruct((B, 4 * B), jnp.float32),
        grid=(1,),
        in_specs=[
            pl.BlockSpec((TB, H), lambda i: (0, 0)),
            pl.BlockSpec((B, B), lambda i: (0, 0)),
        ],
        out_specs=pl.BlockSpec((B, 4 * B), lambda i: (0, 0)),
        compiler_params=pltpu.CompilerParams(
            dimension_semantics=("arbitrary",)),
    )(pooled, logit_mask)

    predict_logits = packed[:, 0 * B:1 * B]
    soft_label = packed[:, 1 * B:2 * B]
    ss_masked = packed[:, 2 * B:3 * B]
    tt_masked = packed[:, 3 * B:4 * B]
    return predict_logits, soft_label, ss_masked, tt_masked


# ------------------------------------------------------------------------------------
# Loss glue (matches nn.CrossEntropyLoss(reduction='mean', label_smoothing=ls))
# ------------------------------------------------------------------------------------
def ce_int_labels(logits, labels, ls):
    C = logits.shape[1]
    logp = jax.nn.log_softmax(logits, axis=1)
    tgt = jax.nn.one_hot(labels, C, dtype=logits.dtype) * (1.0 - ls) + ls / C
    return -jnp.mean(jnp.sum(tgt * logp, axis=1))


def ce_soft_labels(logits, target, ls):
    C = logits.shape[1]
    logp = jax.nn.log_softmax(logits, axis=1)
    tgt = target * (1.0 - ls) + ls / C
    return -jnp.mean(jnp.sum(tgt * logp, axis=1))


# ------------------------------------------------------------------------------------
# Model wrapper (forward pass, training branch: inference=False)
# ------------------------------------------------------------------------------------
ARGS = dict(
    pooler_type="mean", sim_type="cos",
    temperature=0.05, label_smoothing=0.1,
    ce_w=1.0, sl_s=0.5, sl_t=0.5,
    kd=True, temperature2=0.5, kd_w=0.5,
    hn=True, hn_ss=0.3, hn_tt=0.3, hn_st=0.4, temperature3=0.5, hn_w=0.5,
)


def rank_race_forward(params, src_input_ids, src_attention_mask,
                      tgt_input_ids, tgt_attention_mask, src_ids):
    a = ARGS
    emb_table, w, b = params["emb"], params["w"], params["b"]

    B, S = src_input_ids.shape

    # ---- JAX glue: embedding lookup + pooling weights + logit-mask construction ------
    ids_stacked = jnp.concatenate([src_input_ids, tgt_input_ids], axis=0)      # (2B, S)
    emb_stacked = emb_table[ids_stacked].astype(jnp.bfloat16)                  # (2B, S, Hin)
    mask_stacked = jnp.concatenate(
        [src_attention_mask, tgt_attention_mask], axis=0).astype(jnp.float32)  # (2B, S)
    # clamp denominator so an all-zero mask does not produce inf/NaN
    inv_len = 1.0 / jnp.maximum(jnp.sum(mask_stacked, axis=1, keepdims=True), 1.0)
    pool_w = mask_stacked * inv_len                                            # (2B, S)

    eye = jnp.eye(B, dtype=jnp.float32)
    logit_mask = (src_ids[:, None] == src_ids[None, :]).astype(jnp.float32) - eye

    # ---- Pallas kernels: encode + pool (tiled), then normalize + similarities --------
    predict_logits, soft_label, ss_masked, tt_masked = rankrace_similarities(
        emb_stacked, pool_w, w.astype(jnp.bfloat16), b, logit_mask,
        a["temperature"], a["sl_s"], a["sl_t"],
    )

    label = jnp.arange(B)
    predict_loss = a["ce_w"] * ce_int_labels(predict_logits, label, a["label_smoothing"])

    if a["kd"]:
        soft_label_kd = jax.lax.stop_gradient(
            jax.nn.softmax(soft_label / a["temperature2"], axis=1)
        )
        predict_loss += a["kd_w"] * ce_soft_labels(
            predict_logits, soft_label_kd, a["label_smoothing"]
        )

    if a["hn"]:
        # data-dependent hard-negative gather: stays in plain JAX (tiny B x 2 tensors)
        logits_hn = (a["hn_ss"] * ss_masked + a["hn_tt"] * tt_masked
                     + a["hn_st"] * predict_logits)
        j_star = jnp.argmax(logits_hn - eye * 1e8, axis=1)          # hardest negative
        rows = jnp.arange(B)
        binary_logits_hn = jnp.stack(
            [predict_logits[rows, rows], predict_logits[rows, j_star]], axis=1)
        label_hn = jnp.stack(
            [soft_label[rows, rows], soft_label[rows, j_star]], axis=1)
        label_hn = jax.lax.stop_gradient(
            jax.nn.softmax(label_hn / a["temperature3"], axis=1))
        predict_loss += a["hn_w"] * ce_soft_labels(
            binary_logits_hn, label_hn, a["label_smoothing"])

    predict_result = jnp.argmax(predict_logits, axis=1)
    acc = jnp.mean((predict_result == label).astype(jnp.float32))
    return predict_loss, acc


# ------------------------------------------------------------------------------------
if __name__ == "__main__":
    # lane/sublane friendly demo shapes: Hin = H = 128 (lane-dense), S multiple of 8
    B, S, Hin, H, VOCAB = 8, 8, 128, 128, 100

    key = jax.random.PRNGKey(0)
    k_emb, k_w, k_src, k_tgt = jax.random.split(key, 4)

    params = dict(
        emb=(jax.random.normal(k_emb, (VOCAB, Hin), jnp.float32) * 0.5),
        w=(jax.random.normal(k_w, (Hin, H), jnp.float32) * (1.0 / jnp.sqrt(Hin))),
        b=jnp.zeros((1, H), jnp.float32),
    )

    src_input_ids = jax.random.randint(k_src, (B, S), 0, VOCAB, dtype=jnp.int32)
    tgt_input_ids = jax.random.randint(k_tgt, (B, S), 0, VOCAB, dtype=jnp.int32)

    src_lens = jnp.array([8, 7, 6, 5, 8, 4, 3, 8], jnp.int32)
    tgt_lens = jnp.array([8, 8, 5, 6, 7, 8, 4, 5], jnp.int32)
    pos = jnp.arange(S)[None, :]
    src_attention_mask = (pos < src_lens[:, None]).astype(jnp.float32)
    tgt_attention_mask = (pos < tgt_lens[:, None]).astype(jnp.float32)

    # duplicate source id (0 appears twice) to exercise the logit mask
    src_ids = jnp.array([0, 1, 2, 3, 0, 5, 6, 7], jnp.int32)

    fwd = jax.jit(rank_race_forward)
    loss, acc = fwd(params, src_input_ids, src_attention_mask,
                    tgt_input_ids, tgt_attention_mask, src_ids)
    jax.block_until_ready((loss, acc))
    print("KERNEL_OK")
</pallas_src>

<mosaic_0001>
module attributes {stable_mosaic.version = 11 : i64} {
  func.func @encode_pool_kernel(%arg0: i32, %arg1: memref<8x8x128xbf16, #tpu.memory_space<vmem>>, %arg2: memref<8x8xf32, #tpu.memory_space<vmem>>, %arg3: memref<128x128xbf16, #tpu.memory_space<vmem>>, %arg4: memref<1x128xf32, #tpu.memory_space<vmem>>, %arg5: memref<8x128xf32, #tpu.memory_space<vmem>>) attributes {dimension_semantics = [#tpu.dimension_semantics<parallel>], iteration_bounds = array<i64: 2>, scalar_prefetch = 0 : i64, scratch_operands = 0 : i64, tpu.core_type = #tpu.core_type<tc>, window_params = [{transform_indices = @transform_0, window_bounds = array<i64: 8, 8, 128>}, {transform_indices = @transform_1, window_bounds = array<i64: 8, 8>}, {pipeline_mode = #tpu.pipeline_mode<synchronous>, transform_indices = @transform_2, window_bounds = array<i64: 128, 128>}, {pipeline_mode = #tpu.pipeline_mode<synchronous>, transform_indices = @transform_3, window_bounds = array<i64: 1, 128>}, {transform_indices = @transform_4, window_bounds = array<i64: 8, 128>}]} {
    %c0 = arith.constant 0 : index
    %c0_0 = arith.constant 0 : index
    %c0_1 = arith.constant 0 : index
    %0 = vector.load %arg1[%c0, %c0_0, %c0_1] : memref<8x8x128xbf16, #tpu.memory_space<vmem>>, vector<8x8x128xbf16>
    %1 = vector.shape_cast %0 : vector<8x8x128xbf16> to vector<64x128xbf16>
    %c0_2 = arith.constant 0 : index
    %c0_3 = arith.constant 0 : index
    %2 = vector.load %arg3[%c0_2, %c0_3] : memref<128x128xbf16, #tpu.memory_space<vmem>>, vector<128x128xbf16>
    %cst = arith.constant dense<0.000000e+00> : vector<64x128xf32>
    %3 = tpu.matmul %1, %2, %cst {dimension_numbers = #tpu.dot_dimension_numbers<[1], [0], [0], [1], [0, 0, 1, 1], [], []>} : vector<64x128xbf16>, vector<128x128xbf16>, vector<64x128xf32> -> vector<64x128xf32>
    %c0_4 = arith.constant 0 : index
    %c0_5 = arith.constant 0 : index
    %4 = vector.load %arg4[%c0_4, %c0_5] : memref<1x128xf32, #tpu.memory_space<vmem>>, vector<1x128xf32>
    %5 = vector.broadcast %4 : vector<1x128xf32> to vector<64x128xf32>
    %6 = arith.addf %3, %5 : vector<64x128xf32>
    %7 = math.tanh %6 : vector<64x128xf32>
    %8 = vector.shape_cast %7 : vector<64x128xf32> to vector<8x8x128xf32>
    %c0_6 = arith.constant 0 : index
    %c0_7 = arith.constant 0 : index
    %9 = vector.load %arg2[%c0_6, %c0_7] : memref<8x8xf32, #tpu.memory_space<vmem>>, vector<8x8xf32>
    %10 = vector.shape_cast %9 : vector<8x8xf32> to vector<8x8x1xf32>
    %11 = vector.broadcast %10 : vector<8x8x1xf32> to vector<8x8x128xf32>
    %12 = arith.mulf %8, %11 : vector<8x8x128xf32>
    %cst_8 = arith.constant dense<0.000000e+00> : vector<8x128xf32>
    %13 = vector.multi_reduction <add>, %12, %cst_8 [1] : vector<8x8x128xf32> to vector<8x128xf32>
    %c0_9 = arith.constant 0 : index
    %c0_10 = arith.constant 0 : index
    %14 = vector.load %arg5[%c0_9, %c0_10] : memref<8x128xf32, #tpu.memory_space<vmem>>, vector<8x128xf32>
    tpu.vector_store %arg5[%c0_9, %c0_10], %13 {strides = array<i32>} : memref<8x128xf32, #tpu.memory_space<vmem>>, vector<8x128xf32>,
    return
  }
  func.func @transform_0(%arg0: i32) -> (i32, i32, i32) {
    %c0_i32 = arith.constant 0 : i32
    %c0_i32_0 = arith.constant 0 : i32
    %c0_i32_1 = arith.constant 0 : i32
    return %arg0, %c0_i32, %c0_i32_0 : i32, i32, i32
  }
  func.func @transform_1(%arg0: i32) -> (i32, i32) {
    %c0_i32 = arith.constant 0 : i32
    %c0_i32_0 = arith.constant 0 : i32
    return %arg0, %c0_i32 : i32, i32
  }
  func.func @transform_2(%arg0: i32) -> (i32, i32) {
    %c0_i32 = arith.constant 0 : i32
    %c0_i32_0 = arith.constant 0 : i32
    %c0_i32_1 = arith.constant 0 : i32
    return %c0_i32, %c0_i32_0 : i32, i32
  }
  func.func @transform_3(%arg0: i32) -> (i32, i32) {
    %c0_i32 = arith.constant 0 : i32
    %c0_i32_0 = arith.constant 0 : i32
    %c0_i32_1 = arith.constant 0 : i32
    return %c0_i32, %c0_i32_0 : i32, i32
  }
  func.func @transform_4(%arg0: i32) -> (i32, i32) {
    %c0_i32 = arith.constant 0 : i32
    %c0_i32_0 = arith.constant 0 : i32
    return %arg0, %c0_i32 : i32, i32
  }
}

module attributes {stable_mosaic.version = 11 : i64} {
  func.func @sim_pack_kernel(%arg0: i32, %arg1: memref<16x128xf32, #tpu.memory_space<vmem>>, %arg2: memref<8x8xf32, #tpu.memory_space<vmem>>, %arg3: memref<8x32xf32, #tpu.memory_space<vmem>>) attributes {dimension_semantics = [#tpu.dimension_semantics<arbitrary>], iteration_bounds = array<i64: 1>, scalar_prefetch = 0 : i64, scratch_operands = 0 : i64, tpu.core_type = #tpu.core_type<tc>, window_params = [{pipeline_mode = #tpu.pipeline_mode<synchronous>, transform_indices = @transform_0, window_bounds = array<i64: 16, 128>}, {pipeline_mode = #tpu.pipeline_mode<synchronous>, transform_indices = @transform_1, window_bounds = array<i64: 8, 8>}, {pipeline_mode = #tpu.pipeline_mode<synchronous>, transform_indices = @transform_2, window_bounds = array<i64: 8, 32>}]} {
    %c0 = arith.constant 0 : index
    %c0_0 = arith.constant 0 : index
    %0 = vector.load %arg1[%c0, %c0_0] : memref<16x128xf32, #tpu.memory_space<vmem>>, vector<16x128xf32>
    %1 = arith.mulf %0, %0 : vector<16x128xf32>
    %cst = arith.constant dense<0.000000e+00> : vector<16xf32>
    %2 = vector.multi_reduction <add>, %1, %cst [1] : vector<16x128xf32> to vector<16xf32>
    %3 = vector.shape_cast %2 : vector<16xf32> to vector<16x1xf32>
    %cst_1 = arith.constant 1.000000e-24 : f32
    %4 = vector.broadcast %cst_1 : f32 to vector<16x1xf32>
    %5 = arith.maximumf %3, %4 : vector<16x1xf32>
    %6 = math.rsqrt %5 : vector<16x1xf32>
    %7 = vector.broadcast %6 : vector<16x1xf32> to vector<16x128xf32>
    %8 = arith.mulf %0, %7 : vector<16x128xf32>
    %cst_2 = arith.constant dense<0.000000e+00> : vector<16x16xf32>
    %9 = tpu.matmul %8, %8, %cst_2 {dimension_numbers = #tpu.dot_dimension_numbers<[1], [1], [0], [0], [0, 0, 1, 0], [], []>} : vector<16x128xf32>, vector<16x128xf32>, vector<16x16xf32> -> vector<16x16xf32>
    %10 = vector.extract_strided_slice %9 {offsets = [0, 8], sizes = [8, 8], strides = [1, 1]} : vector<16x16xf32> to vector<8x8xf32>
    %11 = vector.extract_strided_slice %9 {offsets = [0, 0], sizes = [8, 8], strides = [1, 1]} : vector<16x16xf32> to vector<8x8xf32>
    %12 = vector.extract_strided_slice %9 {offsets = [8, 8], sizes = [8, 8], strides = [1, 1]} : vector<16x16xf32> to vector<8x8xf32>
    %c0_3 = arith.constant 0 : index
    %c0_4 = arith.constant 0 : index
    %13 = vector.load %arg2[%c0_3, %c0_4] : memref<8x8xf32, #tpu.memory_space<vmem>>, vector<8x8xf32>
    %cst_5 = arith.constant 1.000000e+08 : f32
    %14 = vector.broadcast %cst_5 : f32 to vector<8x8xf32>
    %15 = arith.mulf %13, %14 : vector<8x8xf32>
    %cst_6 = arith.constant 2.000000e+01 : f32
    %16 = vector.broadcast %cst_6 : f32 to vector<8x8xf32>
    %17 = arith.mulf %10, %16 : vector<8x8xf32>
    %18 = arith.subf %17, %15 : vector<8x8xf32>
    %cst_7 = arith.constant 5.000000e-01 : f32
    %19 = vector.broadcast %cst_7 : f32 to vector<8x8xf32>
    %20 = arith.mulf %19, %11 : vector<8x8xf32>
    %cst_8 = arith.constant 5.000000e-01 : f32
    %21 = vector.broadcast %cst_8 : f32 to vector<8x8xf32>
    %22 = arith.mulf %21, %12 : vector<8x8xf32>
    %23 = arith.addf %20, %22 : vector<8x8xf32>
    %24 = arith.subf %11, %15 : vector<8x8xf32>
    %25 = arith.subf %12, %15 : vector<8x8xf32>
    %26 = tpu.concatenate %18, %23, %24, %25 in 1 : vector<8x8xf32>, vector<8x8xf32>, vector<8x8xf32>, vector<8x8xf32> -> vector<8x32xf32>
    %c0_9 = arith.constant 0 : index
    %c0_10 = arith.constant 0 : index
    %27 = vector.load %arg3[%c0_9, %c0_10] : memref<8x32xf32, #tpu.memory_space<vmem>>, vector<8x32xf32>
    tpu.vector_store %arg3[%c0_9, %c0_10], %26 {strides = array<i32>} : memref<8x32xf32, #tpu.memory_space<vmem>>, vector<8x32xf32>,
    return
  }
  func.func @transform_0(%arg0: i32) -> (i32, i32) {
    %c0_i32 = arith.constant 0 : i32
    %c0_i32_0 = arith.constant 0 : i32
    %c0_i32_1 = arith.constant 0 : i32
    return %c0_i32, %c0_i32_0 : i32, i32
  }
  func.func @transform_1(%arg0: i32) -> (i32, i32) {
    %c0_i32 = arith.constant 0 : i32
    %c0_i32_0 = arith.constant 0 : i32
    %c0_i32_1 = arith.constant 0 : i32
    return %c0_i32, %c0_i32_0 : i32, i32
  }
  func.func @transform_2(%arg0: i32) -> (i32, i32) {
    %c0_i32 = arith.constant 0 : i32
    %c0_i32_0 = arith.constant 0 : i32
    %c0_i32_1 = arith.constant 0 : i32
    return %c0_i32, %c0_i32_0 : i32, i32
  }
}

</mosaic_0001>

<bundles_post_ra>
// kernel: rank_race_forward.3
= control target key start
LH: loop header
LB: loop body
LE: loop exit
PB: predicated region body
PF: predicated region fallthrough
CT: control target
= control target key end

     0   :  { %s167_s15 = smov 8   ;;  %vm133_vm0 = vcmask 64512   ;;  %vm135_vm1 = vcmask 130048   ;;  %vm137_vm2 = vcmask 195584   ;;  %vm139_vm3 = vcmask 261120   ;;  %s199_s0 = inlined_call_operand.vmem [shape: f32[16,128], index: 0, kind: input, shape index: {}]   ;;  %s200_s1 = inlined_call_operand.vmem [shape: f32[8,8], index: 1, kind: input, shape index: {}]   ;;  %s201_s2 = inlined_call_operand.vmem [shape: f32[8,32], index: 2, kind: output, shape index: {}]  }
   0x1   :  { %v11_v0 = vld [vmem:[%s199_s0] sm:$0xff]  ;;  %v12_v1 = vld [vmem:[%s199_s0 + $0x8] sm:$0xff]  ;;  %s168_s0 = smov 120  }
   0x2   :  { %v13_v2 = vmul.f32 %v11_v0, %v11_v0  ;;  %v14_v3 = vmul.f32 %v12_v1, %v12_v1  ;;  %v100_v4 = vld [vmem:[%s200_s1] sm:$0xff]  ;;  %s169_s1 = smov 16  }
   0x3   :  { %v101_v5 = vmul.f32 1e+08, %v100_v4 }
   0x4   :  { %15 = vadd.xlane.f32.xlu0 %v13_v2 }
   0x5   :  { %104 = vrot.lane.b32.xlu1 %v101_v5, %s167_s15 }
   0x8   :  { %17 = vadd.xlane.f32.xlu0 %v14_v3 }
  0x77   :  { %v105_v19 = vpop.permute.xlu1 %104 }
  0x91   :  { %v16_v6 = vpop.xlane.xlu0 %15 }
  0x92   :  { %v19_v7 = vmax.f32 %v16_v6, 1e-24 }
  0x94   :  { %163 = vrsqrt.f32 %v19_v7 }
  0x95   :  { %v18_v8 = vpop.xlane.xlu0 %17 }
  0x96   :  { %v20_v9 = vmax.f32 %v18_v8, 1e-24 }
  0x98   :  { %165 = vrsqrt.f32 %v20_v9 }
  0x9e   :  { %v164_v10 = vpop.eup %163 }
  0x9f   :  { %v23_v11 = vmul.f32 %v164_v10, %v11_v0 }
  0xa1   :  { %153 = vmatprep.mubr.f32.mxu0 %v23_v11 }
  0xa2   :  { %v166_v12 = vpop.eup %165 }
  0xa3   :  { %v24_v13 = vmul.f32 %v166_v12, %v12_v1 }
  0xa5   :  { %v156_v14 = vpack.c.bf16 %v24_v13, %v23_v11 }
  0xa7   :  { %157 = vmatprep.subr.bf16.mxu0 %v156_v14 }
  0xa8   :  { %159 = vmatpush3.bf16.xpose.msra.mxu0 %v156_v14 }
  0xaf   :  { %154 = vmatmul.mubr.f32.vlgmr.msra.gmra.mrb[0].mxu0 %v24_v13 }
 0x182   :  { %v155_v15 = vpop.f32.mrb[0].mxu0 }
 0x183   :  { %v109_v16 = vmul.f32 0.5, %v155_v15  ;;  %v91_v17 = vpop.f32.mrb[1].mxu0  ;;  %v116_v25 = vsub.f32 %v155_v15, %v105_v19 }
 0x184   :  { %v102_v18 = vmul.f32 20.0, %v91_v17  ;;  %v115_v21 = vsub.f32 %v91_v17, %v101_v5  ;;  %v108_v22 = vmul.f32 0.5, %v91_v17 }
 0x185   :  { %111 = vrot.lane.b32.xlu1 %v109_v16, %s168_s0 }
 0x186   :  { %v107_v20 = vsub.f32 %v102_v18, %v105_v19 }
 0x188   :  { %118 = vrot.lane.b32.xlu0 %v107_v20, %s168_s0 }
 0x189   :  { %126 = vrot.lane.b32.xlu1 %v115_v21, %s169_s1 }
 0x1f7   :  { %v112_v23 = vpop.permute.xlu1 %111 }
 0x1f8   :  { %v114_v24 = vadd.f32 %v112_v23, %v108_v22 }
 0x1fa   :  { %122 = vrot.lane.b32.xlu1 %v114_v24, %s167_s15  ;;  %v119_v27 = vpop.permute.xlu0 %118 }
 0x1fb   :  { %v127_v26 = vpop.permute.xlu1 %126 }
 0x1fe   :  { %130 = vrot.lane.b32.xlu1 %v116_v25, %s169_s1 }
 0x26c   :  { %v123_v28 = vpop.permute.xlu1 %122 }
 0x26d   :  { %v134_v29 = vsel %vm133_vm0, %v119_v27, %v123_v28 }
 0x26e   :  { %v136_v31 = vsel %vm135_vm1, %v134_v29, %v127_v26 }
 0x270   :  { %v131_v30 = vpop.permute.xlu1 %130 }
 0x271   :  { %v138_v32 = vsel %vm137_vm2, %v136_v31, %v131_v30 }
 0x272   :  { %140 = vst.msk [vmem:[%s201_s2] sm:$0xff] %vm139_vm3, %v138_v32 }

// kernel: rank_race_forward.2
= control target key start
LH: loop header
LB: loop body
LE: loop exit
PB: predicated region body
PF: predicated region fallthrough
CT: control target
= control target key end

     0   :  { %s739_s15 = smov 0   ;;  %s799_s0 = inlined_call_operand.vmem [shape: bf16[16,8,128], index: 0, kind: input, shape index: {}]   ;;  %s800_s1 = inlined_call_operand.vmem [shape: f32[16,8], index: 1, kind: input, shape index: {}]   ;;  %s801_s2 = inlined_call_operand.vmem [shape: bf16[128,128], index: 2, kind: input, shape index: {}]   ;;  %s802_s3 = inlined_call_operand.vmem [shape: f32[1,128], index: 3, kind: input, shape index: {}]   ;;  %s803_s4 = inlined_call_operand.vmem [shape: f32[16,128], index: 4, kind: output, shape index: {}]  }
   0x1 LB: > { %s594_s16 = sadd.s32 4294967295, %s712_s15   ;;  %p598_p0 = scmp.ge.s32.totalorder %s712_s15, 1  ;;  %s712_s15 = sphi %s739_s15, %s14_s15  }
   0x2   : > { %p172_p1 = scmp.lt.s32.totalorder %s712_s15, 3 }
   0x4   : > { %p173_p2 = pnand %p598_p0, %p172_p1 }
   0x5   : > { %v678_v0 = vld [vmem:[%s801_s2] sm:$0xff] (!%p173_p2)   ;;  %s599_s19 = sshll.u32 (!%p173_p2), %s594_s16, 3  ;;  %v679_v1 = vld [vmem:[%s801_s2 + $0x8] sm:$0xff] (!%p173_p2)   ;;  %p207_p4 = scmp.lt.s32.totalorder (!%p173_p2), %s594_s16, 1  ;;  %v393_v2 = vlaneseq (!%p173_p2)  ;;  %v680_v3 = vld [vmem:[%s801_s2 + $0x10] sm:$0xff] (!%p173_p2)   ;;  %vm513_vm0 = vcmask (!%p173_p2), 1041409  }
   0x6   : > { %176 = sbr.rel (%p173_p2) target bundleno = 291 (0x123), region = 36  ;;  %p202_p3 = scmp.lt.s32.totalorder (!%p173_p2), %s599_s19, 15  ;;  %630 = vmatprep.subr.bf16.mxu0 (!%p173_p2), %v678_v0  ;;  %654 = vmatprep.subr.bf16.mxu1 (!%p173_p2), %v678_v0  ;;  %v681_v4 = vld [vmem:[%s801_s2 + $0x18] sm:$0xff] (!%p173_p2)   ;;  %v682_v10 = vld [vmem:[%s801_s2 + $0x20] sm:$0xff] (!%p173_p2)   ;;  %v683_v16 = vld [vmem:[%s801_s2 + $0x28] sm:$0xff] (!%p173_p2)   ;;  %vm515_vm1 = vcmask (!%p173_p2), 1042434  }
   0x7   : > { %631 = vmatpush3.bf16.msra.mxu0 (!%p173_p2), %v678_v0  ;;  %662 = vmatpush3.bf16.msra.mxu1 (!%p173_p2), %v678_v0  ;;  %v394_v5 = vshrl.u32 (!%p173_p2), %v393_v2, 7  ;;  %v684_v21 = vld [vmem:[%s801_s2 + $0x30] sm:$0xff] (!%p173_p2)   ;;  %v685_v26 = vld [vmem:[%s801_s2 + $0x38] sm:$0xff] (!%p173_p2)   ;;  %v603_v32 = vld [vmem:[%s802_s3] ss:$0 sm:$0xff] (!%p173_p2)  ;;  %vm517_vm2 = vcmask (!%p173_p2), 1043459  }
   0x8   : > { %632 = vmatprep.subr.bf16.mxu0 (!%p173_p2), %v679_v1  ;;  %655 = vmatprep.subr.bf16.mxu1 (!%p173_p2), %v679_v1  ;;  %vm519_vm3 = vcmask (!%p173_p2), 1044484   ;;  %vm521_vm4 = vcmask (!%p173_p2), 1045509   ;;  %vm523_vm5 = vcmask (!%p173_p2), 1046534   ;;  %vm525_vm6 = vcmask (!%p173_p2), 1047559  }
   0x9   : > { %v395_v8 = vsub.s32 (!%p173_p2), 0, %v394_v5  ;;  %v409_v9 = vsub.s32 (!%p173_p2), 2, %v394_v5  ;;  %v402_v14 = vsub.s32 (!%p173_p2), 1, %v394_v5  ;;  %v416_v15 = vsub.s32 (!%p173_p2), 3, %v394_v5 }
   0xa   : > { %v423_v19 = vsub.s32 (!%p173_p2), 4, %v394_v5  ;;  %v430_v20 = vsub.s32 (!%p173_p2), 5, %v394_v5  ;;  %v437_v24 = vsub.s32 (!%p173_p2), 6, %v394_v5  ;;  %v444_v25 = vsub.s32 (!%p173_p2), 7, %v394_v5 }
   0xb   : > { %633 = vmatpush3.bf16.msra.mxu0 (!%p173_p2), %v679_v1  ;;  %663 = vmatpush3.bf16.msra.mxu1 (!%p173_p2), %v679_v1 }
   0xc   : > { %634 = vmatprep.subr.bf16.mxu0 (!%p173_p2), %v680_v3  ;;  %656 = vmatprep.subr.bf16.mxu1 (!%p173_p2), %v680_v3 }
   0xd   : > { %s805_s19 = smov (!%p202_p3, %s599_s19), 15  ;;  %s807_s16 = smov (!%p207_p4, %s594_s16), 1 }
   0xe   : > { %s600_s24 = sshll.u32 %s805_s19, 2  ;;  %s601_s28 = sshll.u32 %s807_s16, 3 }
   0xf   : > { %s761_s27 = scalar_lea.vmem %s799_s0, %s600_s24  ;;  %s210_s7 = scalar_lea.vmem %s800_s1, %s601_s28  ;;  %635 = vmatpush3.bf16.msra.mxu0 %v680_v3  ;;  %664 = vmatpush3.bf16.msra.mxu1 %v680_v3 }
  0x10   : > { %v686_v6 = vld [vmem:[%s761_s27] sm:$0xff]   ;;  %v687_v7 = vld [vmem:[%s761_s27 + $0x10] sm:$0xff]   ;;  %636 = vmatprep.subr.bf16.mxu0 %v681_v4  ;;  %657 = vmatprep.subr.bf16.mxu1 %v681_v4  ;;  %v688_v29 = vld [vmem:[%s761_s27 + $0x8] sm:$0xff]   ;;  %s214_s22 = scalar_lea.vmem %s803_s4, %s601_s28 }
  0x11   : > { %646 = vmatprep.mubr.bf16.mxu0 %v686_v6  ;;  %v392_v11 = vld [vmem:[%s210_s7] sm:$0xff]  ;;  %650 = vmatprep.mubr.bf16.mxu1 %v687_v7  ;;  %v689_v30 = vld [vmem:[%s761_s27 + $0x18] sm:$0xff]  }
  0x12   : > { %v396_v12 = vrot.slane %v392_v11, %v395_v8  ;;  %v410_v13 = vrot.slane %v392_v11, %v409_v9  ;;  %v403_v17 = vrot.slane %v392_v11, %v402_v14  ;;  %v417_v18 = vrot.slane %v392_v11, %v416_v15 }
  0x13   : > { %637 = vmatpush3.bf16.msra.mxu0 %v681_v4  ;;  %665 = vmatpush3.bf16.msra.mxu1 %v681_v4  ;;  %v424_v22 = vrot.slane %v392_v11, %v423_v19  ;;  %v431_v23 = vrot.slane %v392_v11, %v430_v20  ;;  %v438_v27 = vrot.slane %v392_v11, %v437_v24 }
  0x14   : > { %638 = vmatprep.subr.bf16.mxu0 %v682_v10  ;;  %658 = vmatprep.subr.bf16.mxu1 %v682_v10  ;;  %v445_v28 = vrot.slane %v392_v11, %v444_v25 }
  0x15   : > { %398 = vbcast.lane.b32.xlu0 %v396_v12, 256  ;;  %412 = vbcast.lane.b32.xlu1 %v410_v13, 256 }
  0x17   : > { %639 = vmatpush3.bf16.msra.mxu0 %v682_v10  ;;  %666 = vmatpush3.bf16.msra.mxu1 %v682_v10 }
  0x18   : > { %640 = vmatprep.subr.bf16.mxu0 %v683_v16  ;;  %659 = vmatprep.subr.bf16.mxu1 %v683_v16 }
  0x19   : > { %405 = vbcast.lane.b32.xlu0 %v403_v17, 256  ;;  %419 = vbcast.lane.b32.xlu1 %v417_v18, 256 }
  0x1b   : > { %641 = vmatpush3.bf16.msra.mxu0 %v683_v16  ;;  %667 = vmatpush3.bf16.msra.mxu1 %v683_v16 }
  0x1c   : > { %642 = vmatprep.subr.bf16.mxu0 %v684_v21  ;;  %660 = vmatprep.subr.bf16.mxu1 %v684_v21 }
  0x1d   : > { %426 = vbcast.lane.b32.xlu0 %v424_v22, 256  ;;  %433 = vbcast.lane.b32.xlu1 %v431_v23, 256 }
  0x1f   : > { %643 = vmatpush3.bf16.msra.mxu0 %v684_v21  ;;  %668 = vmatpush3.bf16.msra.mxu1 %v684_v21 }
  0x20   : > { %644 = vmatprep.subr.bf16.mxu0 %v685_v26  ;;  %661 = vmatprep.subr.bf16.mxu1 %v685_v26 }
  0x21   : > { %440 = vbcast.lane.b32.xlu0 %v438_v27, 256  ;;  %447 = vbcast.lane.b32.xlu1 %v445_v28, 256 }
  0x23   : > { %645 = vmatpush3.bf16.msra.mxu0 %v685_v26  ;;  %669 = vmatpush3.bf16.msra.mxu1 %v685_v26 }
  0x26   : > { %647 = vmatmul.mubr.bf16.vlgmr.msra.gmra.mrb[0].mxu0 %v688_v29  ;;  %651 = vmatmul.mubr.bf16.vlgmr.msra.gmra.mrb[0].mxu1 %v689_v30 }
  0x87   : > { %v399_v31 = vpop.permute.xlu0 %398  ;;  %v413_v33 = vpop.permute.xlu1 %412 }
  0x8b   : > { %v406_v34 = vpop.permute.xlu0 %405  ;;  %v420_v49 = vpop.permute.xlu1 %419 }
  0x8f   : > { %v427_v52 = vpop.permute.xlu0 %426  ;;  %v434_v53 = vpop.permute.xlu1 %433 }
  0x93   : > { %v441_v54 = vpop.permute.xlu0 %440  ;;  %v448_v63 = vpop.permute.xlu1 %447 }
  0xf9   : > { %v648_v35 = vpop.f32.mrb[0].mxu0  ;;  %v652_v36 = vpop.f32.mrb[0].mxu1 }
  0xfa   : > { %v362_v37 = vadd.f32 %v648_v35, %v603_v32  ;;  %v378_v38 = vadd.f32 %v652_v36, %v603_v32  ;;  %v353_v39 = vpop.f32.mrb[1].mxu0  ;;  %v369_v40 = vpop.f32.mrb[1].mxu1 }
  0xfb   : > { %v354_v41 = vadd.f32 %v603_v32, %v353_v39  ;;  %v370_v42 = vadd.f32 %v603_v32, %v369_v40  ;;  %v649_v43 = vpop.f32.mrb[2].mxu0  ;;  %v653_v44 = vpop.f32.mrb[2].mxu1 }
  0xfc   : > { %690 = vtanh.f32 %v362_v37  ;;  %v365_v45 = vadd.f32 %v649_v43, %v603_v32  ;;  %v356_v46 = vpop.f32.mrb[3].mxu0  ;;  %v372_v47 = vpop.f32.mrb[3].mxu1  ;;  %v381_v48 = vadd.f32 %v653_v44, %v603_v32 }
  0xfd   : > { %692 = vtanh.f32 %v378_v38  ;;  %v357_v50 = vadd.f32 %v603_v32, %v356_v46  ;;  %v373_v51 = vadd.f32 %v603_v32, %v372_v47 }
  0xfe   : > { %694 = vtanh.f32 %v354_v41 }
  0xff   : > { %696 = vtanh.f32 %v370_v42 }
 0x100   : > { %698 = vtanh.f32 %v365_v45 }
 0x101   : > { %700 = vtanh.f32 %v381_v48 }
 0x102   : > { %702 = vtanh.f32 %v357_v50 }
 0x103   : > { %704 = vtanh.f32 %v373_v51 }
 0x106   : > { %v691_v55 = vpop.eup %690 }
 0x107   : > { %v693_v56 = vpop.eup %692  ;;  %v451_v57 = vmul.f32 %v691_v55, %v413_v33 }
 0x108   : > { %v695_v58 = vpop.eup %694  ;;  %v455_v59 = vmul.f32 %v693_v56, %v441_v54 }
 0x109   : > { %v697_v60 = vpop.eup %696  ;;  %v449_v61 = vmul.f32 %v695_v58, %v399_v31  ;;  %v469_v62 = vrot.slane %v451_v57, 4 }
 0x10a   : > { %v699_v0 = vpop.eup %698  ;;  %v453_v1 = vmul.f32 %v697_v60, %v427_v52  ;;  %v493_v2 = vrot.slane %v455_v59, 4 }
 0x10b   : > { %v701_v3 = vpop.eup %700  ;;  %v457_v4 = vrot.slane %v449_v61, 4  ;;  %v470_v5 = vadd.f32 %v469_v62, %v451_v57  ;;  %v452_v6 = vmul.f32 %v699_v0, %v420_v49 }
 0x10c   : > { %v703_v7 = vpop.eup %702  ;;  %v481_v8 = vrot.slane %v453_v1, 4  ;;  %v456_v9 = vmul.f32 %v701_v3, %v448_v63  ;;  %v494_v14 = vadd.f32 %v493_v2, %v455_v59 }
 0x10d   : > { %v705_v10 = vpop.eup %704  ;;  %v458_v11 = vadd.f32 %v457_v4, %v449_v61  ;;  %v450_v12 = vmul.f32 %v703_v7, %v406_v34  ;;  %v475_v13 = vrot.slane %v452_v6, 4  ;;  %v471_v15 = vrot.slane %v470_v5, 2 }
 0x10e   : > { %v482_v16 = vadd.f32 %v481_v8, %v453_v1  ;;  %v454_v17 = vmul.f32 %v705_v10, %v434_v53  ;;  %v499_v18 = vrot.slane %v456_v9, 4  ;;  %v495_v30 = vrot.slane %v494_v14, 2 }
 0x10f   : > { %v459_v19 = vrot.slane %v458_v11, 2  ;;  %v463_v20 = vrot.slane %v450_v12, 4  ;;  %v476_v21 = vadd.f32 %v475_v13, %v452_v6  ;;  %v472_v28 = vadd.f32 %v471_v15, %v470_v5 }
 0x110   : > { %v483_v22 = vrot.slane %v482_v16, 2  ;;  %v487_v23 = vrot.slane %v454_v17, 4  ;;  %v500_v24 = vadd.f32 %v499_v18, %v456_v9  ;;  %v496_v40 = vadd.f32 %v495_v30, %v494_v14 }
 0x111   : > { %v460_v25 = vadd.f32 %v459_v19, %v458_v11  ;;  %v464_v26 = vadd.f32 %v463_v20, %v450_v12  ;;  %v477_v27 = vrot.slane %v476_v21, 2  ;;  %v473_v38 = vrot.slane %v472_v28, 1 }
 0x112   : > { %v488_v29 = vadd.f32 %v487_v23, %v454_v17  ;;  %v501_v33 = vrot.slane %v500_v24, 2  ;;  %v484_v34 = vadd.f32 %v483_v22, %v482_v16  ;;  %v497_v49 = vrot.slane %v496_v40, 1 }
 0x113   : > { %v465_v31 = vrot.slane %v464_v26, 2  ;;  %v478_v32 = vadd.f32 %v477_v27, %v476_v21  ;;  %v461_v36 = vrot.slane %v460_v25, 1  ;;  %v474_v48 = vadd.f32 %v473_v38, %v472_v28 }
 0x114   : > { %v489_v35 = vrot.slane %v488_v29, 2  ;;  %v502_v43 = vadd.f32 %v501_v33, %v500_v24  ;;  %v485_v44 = vrot.slane %v484_v34, 1  ;;  %v498_v58 = vadd.f32 %v497_v49, %v496_v40 }
 0x115   : > { %v466_v37 = vadd.f32 %v465_v31, %v464_v26  ;;  %v479_v42 = vrot.slane %v478_v32, 1  ;;  %v462_v45 = vadd.f32 %v461_v36, %v460_v25 }
 0x116   : > { %v490_v39 = vadd.f32 %v489_v35, %v488_v29  ;;  %v503_v52 = vrot.slane %v502_v43, 1  ;;  %v486_v54 = vadd.f32 %v485_v44, %v484_v34 }
 0x117   : > { %v467_v41 = vrot.slane %v466_v37, 1  ;;  %v480_v51 = vadd.f32 %v479_v42, %v478_v32 }
 0x118   : > { %v491_v47 = vrot.slane %v490_v39, 1  ;;  %v504_v60 = vadd.f32 %v503_v52, %v502_v43 }
 0x119   : > { %v468_v46 = vadd.f32 %v467_v41, %v466_v37 }
 0x11a   : > { %v492_v56 = vadd.f32 %v491_v47, %v490_v39 }
 0x11b   : > { %v514_v50 = vsel %vm513_vm0, %v468_v46, %v462_v45 }
 0x11c   : > { %v516_v53 = vsel %vm515_vm1, %v474_v48, %v514_v50 }
 0x11d   : > { %v518_v55 = vsel %vm517_vm2, %v480_v51, %v516_v53 }
 0x11e   : > { %v520_v57 = vsel %vm519_vm3, %v486_v54, %v518_v55 }
 0x11f   : > { %v522_v59 = vsel %vm521_vm4, %v492_v56, %v520_v57 }
 0x120   : > { %v524_v61 = vsel %vm523_vm5, %v498_v58, %v522_v59 }
 0x121   : > { %v526_v62 = vsel %vm525_vm6, %v504_v60, %v524_v61 }
 0x122   : > { %528 = vst [vmem:[%s214_s22] sm:$0xff] %v526_v62 }
 0x123 PF: > { %s14_s15 = sadd.s32 1, %s712_s15  }
 0x124   : > { %p11_p5 = scmp.ge.s32.totalorder %s14_s15, 4  }
 0x126   :  { %13 = sbr.rel (!%p11_p5) target bundleno = 1 (0x1), region = 69 }

</bundles_post_ra>
